<compile_context>
chip_gen: v7x
topology: tpu7x:2x2x1
jax: 0.10.0
libtpu: 0.0.40
codegen_flags: <defaults>
</compile_context>

<pallas_src>
import functools

import jax
import jax.numpy as jnp
from jax.experimental import pallas as pl
from jax.experimental.pallas import tpu as pltpu


def _round_up(x, m):
    return ((x + m - 1) // m) * m


def _physical_vmem_bytes():
    """Per-TensorCore VMEM capacity; conservative 64 MiB (v7x) fallback."""
    default = 64 * 1024 * 1024
    try:
        info = pltpu.get_tpu_info()
        cap = int(getattr(info, "vmem_capacity_bytes", default))
        return cap if cap > 0 else default
    except Exception:
        return default


# ---------------------------------------------------------------------------
# LayerNorm math (matches the PyTorch code: unbiased std, eps added to std).
# ---------------------------------------------------------------------------
def _ln_f32(y, a, b, eps):
    d = y.shape[-1]
    mean = jnp.mean(y, axis=-1, keepdims=True)
    c = y - mean
    var = jnp.sum(c * c, axis=-1, keepdims=True) * (1.0 / (d - 1))
    std = jnp.sqrt(var)
    return a * c / (std + eps) + b


# ---------------------------------------------------------------------------
# FFN kernels:  out = relu(x @ w1t + b1) @ w2t + b2   (optionally + fused LayerNorm)
#   w1t: (D, d_ff), w2t: (d_ff, D)  -- pre-transposed once in the wrapper.
# ---------------------------------------------------------------------------
def _ffn_kernel_resident(x_ref, w1_ref, b1_ref, w2_ref, b2_ref, *rest,
                         fuse_ln, eps):
    # Single-step grid axis: full d_ff resident in VMEM, no accumulator scratch.
    if fuse_ln:
        ln_a_ref, ln_b_ref, o_ref = rest
    else:
        (o_ref,) = rest
    h = jnp.dot(x_ref[...], w1_ref[...], preferred_element_type=jnp.float32)
    h = jnp.maximum(h + b1_ref[...], 0.0).astype(x_ref.dtype)
    # TODO(synk): training-mode dropout (p>0) omitted; inference semantics only.
    y = jnp.dot(h, w2_ref[...], preferred_element_type=jnp.float32) + b2_ref[...]
    if fuse_ln:
        y = _ln_f32(y, ln_a_ref[...], ln_b_ref[...], eps)
    o_ref[...] = y.astype(o_ref.dtype)


def _ffn_kernel_streamed(x_ref, w1_ref, b1_ref, w2_ref, b2_ref, *rest,
                         fuse_ln, eps):
    # d_ff reduction axis (k) with an f32 VMEM accumulator for the 2nd matmul.
    if fuse_ln:
        ln_a_ref, ln_b_ref, o_ref, acc_ref = rest
    else:
        o_ref, acc_ref = rest
    k = pl.program_id(1)

    @pl.when(k == 0)
    def _():
        acc_ref[...] = jnp.zeros_like(acc_ref)

    h = jnp.dot(x_ref[...], w1_ref[...], preferred_element_type=jnp.float32)
    h = jnp.maximum(h + b1_ref[...], 0.0).astype(x_ref.dtype)
    # TODO(synk): training-mode dropout (p>0) omitted; inference semantics only.
    acc_ref[...] += jnp.dot(h, w2_ref[...], preferred_element_type=jnp.float32)

    @pl.when(k == pl.num_programs(1) - 1)
    def _():
        y = acc_ref[...] + b2_ref[...]
        if fuse_ln:
            y = _ln_f32(y, ln_a_ref[...], ln_b_ref[...], eps)
        o_ref[...] = y.astype(o_ref.dtype)


# ---------------------------------------------------------------------------
# Tile / budget selection.
# ---------------------------------------------------------------------------
def _choose_tiles(M, D, d_ff, out_itemsize, fuse_ln, budget):
    # Bigger token tiles where VMEM allows (v5e/v6e 128 MiB), conservative on v7x.
    max_tm = 512 if budget >= (80 << 20) else 256
    tm = min(max_tm, _round_up(M, 8))
    # v7x megacore: keep >= 2 token tiles on the "parallel" axis when M allows.
    if _round_up(M, 8) <= tm and M > 8:
        tm = _round_up(_round_up(M, 8) // 2, 8)
    M_pad = _round_up(M, tm)
    grid_i = M_pad // tm

    def working_set(tf_):
        ws = 2 * (tm * D * 2)                              # x tile (bf16), 2 bufs
        ws += 2 * (tm * D * out_itemsize)                  # out tile, 2 bufs
        if tf_ < d_ff:
            ws += tm * D * 4                               # f32 accumulator scratch
        ws += 2 * (tf_ * D * 2 + tf_ * D * 2 + tf_ * 4)    # w1 / w2 / b1 slices
        ws += 2 * (D * 4)                                  # b2
        if fuse_ln:
            ws += 2 * (2 * D * 4)                          # LN scale / shift
        return ws

    # Prefer fully VMEM-resident weights (tf == d_ff => weights DMA'd exactly once);
    # otherwise stream d_ff slices, never below 512 (v5e MXU / store amortization).
    tf = d_ff
    min_tf = min(512, d_ff)
    while (working_set(tf) > budget and tf > min_tf
           and tf % 2 == 0 and d_ff % (tf // 2) == 0):
        tf //= 2
    return tm, M_pad, grid_i, tf, working_set(tf)


# ---------------------------------------------------------------------------
# One FFN layer (optionally with the Decoder's final LayerNorm fused).
# x2: (M_pad, D) bf16.  Returns (M_pad, D) of `out_dtype`.
# ---------------------------------------------------------------------------
def _ffn_layer(x2, w1t, b1r, w2t, b2r, *, ln, out_dtype, tm, tf, eps, vmem_limit):
    M_pad, D = x2.shape
    d_ff = w1t.shape[1]
    grid_i = M_pad // tm
    num_k = d_ff // tf
    fuse_ln = ln is not None

    out_itemsize = jnp.dtype(out_dtype).itemsize
    weight_passes = 1 if num_k == 1 else grid_i   # resident weights stream once
    cost = pl.CostEstimate(
        flops=4 * M_pad * D * d_ff,
        transcendentals=0,
        bytes_accessed=(x2.size * 2 + M_pad * D * out_itemsize
                        + weight_passes * (w1t.size * 2 + w2t.size * 2 + b1r.size * 4)
                        + b2r.size * 4),
    )

    inputs = [x2, w1t, b1r, w2t, b2r]
    if num_k == 1:
        kernel = functools.partial(_ffn_kernel_resident, fuse_ln=fuse_ln, eps=eps)
        grid = (grid_i,)
        in_specs = [
            pl.BlockSpec((tm, D), lambda i: (i, 0)),      # x tile
            pl.BlockSpec((D, d_ff), lambda i: (0, 0)),    # w1t (resident)
            pl.BlockSpec((1, d_ff), lambda i: (0, 0)),    # b1
            pl.BlockSpec((d_ff, D), lambda i: (0, 0)),    # w2t (resident)
            pl.BlockSpec((1, D), lambda i: (0, 0)),       # b2
        ]
        ln_spec = pl.BlockSpec((1, D), lambda i: (0, 0))
        out_spec = pl.BlockSpec((tm, D), lambda i: (i, 0))
        scratch = []
        dims = ("parallel",)
    else:
        # Streaming path: on v5e, consider pipeline_mode=pl.Buffered(3) on the
        # weight specs if xprof shows exposed DMA.
        kernel = functools.partial(_ffn_kernel_streamed, fuse_ln=fuse_ln, eps=eps)
        grid = (grid_i, num_k)
        in_specs = [
            pl.BlockSpec((tm, D), lambda i, k: (i, 0)),   # x tile
            pl.BlockSpec((D, tf), lambda i, k: (0, k)),   # w1t slice
            pl.BlockSpec((1, tf), lambda i, k: (0, k)),   # b1 slice
            pl.BlockSpec((tf, D), lambda i, k: (k, 0)),   # w2t slice
            pl.BlockSpec((1, D), lambda i, k: (0, 0)),    # b2
        ]
        ln_spec = pl.BlockSpec((1, D), lambda i, k: (0, 0))
        out_spec = pl.BlockSpec((tm, D), lambda i, k: (i, 0))
        scratch = [pltpu.VMEM((tm, D), jnp.float32)]
        dims = ("parallel", "arbitrary")

    if fuse_ln:
        ln_a, ln_b = ln
        inputs += [ln_a, ln_b]
        in_specs += [ln_spec, ln_spec]

    return pl.pallas_call(
        kernel,
        out_shape=jax.ShapeDtypeStruct((M_pad, D), out_dtype),
        grid_spec=pltpu.PrefetchScalarGridSpec(
            num_scalar_prefetch=0,
            grid=grid,
            in_specs=in_specs,
            out_specs=out_spec,
            scratch_shapes=scratch,
        ),
        compiler_params=pltpu.CompilerParams(
            dimension_semantics=dims,
            vmem_limit_bytes=vmem_limit,
        ),
        cost_estimate=cost,
    )(*inputs)


# ---------------------------------------------------------------------------
# Standalone LayerNorm kernel (only used for the degenerate N=0 Decoder).
# ---------------------------------------------------------------------------
def _layernorm_kernel(x_ref, a_ref, b_ref, o_ref, *, eps):
    x = x_ref[...].astype(jnp.float32)
    o_ref[...] = _ln_f32(x, a_ref[...], b_ref[...], eps).astype(o_ref.dtype)


def layernorm(x, a_2, b_2, *, eps=1e-6, tm=512):
    B, S, D = x.shape
    M = B * S
    tm = min(tm, _round_up(M, 8))
    if _round_up(M, 8) <= tm and M > 8:
        tm = _round_up(_round_up(M, 8) // 2, 8)
    M_pad = _round_up(M, tm)

    x2 = x.reshape(M, D)
    if M_pad != M:
        x2 = jnp.pad(x2, ((0, M_pad - M), (0, 0)))
    a = a_2.reshape(1, D).astype(jnp.float32)
    b = b_2.reshape(1, D).astype(jnp.float32)

    out2 = pl.pallas_call(
        functools.partial(_layernorm_kernel, eps=eps),
        out_shape=jax.ShapeDtypeStruct((M_pad, D), x.dtype),
        grid_spec=pltpu.PrefetchScalarGridSpec(
            num_scalar_prefetch=0,
            grid=(M_pad // tm,),
            in_specs=[
                pl.BlockSpec((tm, D), lambda i: (i, 0)),
                pl.BlockSpec((1, D), lambda i: (0, 0)),
                pl.BlockSpec((1, D), lambda i: (0, 0)),
            ],
            out_specs=pl.BlockSpec((tm, D), lambda i: (i, 0)),
        ),
        compiler_params=pltpu.CompilerParams(dimension_semantics=("parallel",)),
    )(x2, a, b)
    return out2[:M].reshape(B, S, D)


# ---------------------------------------------------------------------------
# Decoder forward: N layers then LayerNorm (LayerNorm fused into the last layer).
# ---------------------------------------------------------------------------
def decoder_forward(x, memory, src_mask, tgt_mask, layer_params, ln_a, ln_b,
                    *, eps=1e-6):
    # TODO(synk): the generic `layer(x, memory, src_mask, tgt_mask)` of the reference
    # Decoder (masked self-attn, cross-attn over memory, residual sublayers) is not
    # defined in the provided module source; each layer is represented by a
    # position-wise FFN kernel and memory/src_mask/tgt_mask are unused.
    del memory, src_mask, tgt_mask
    B, S, D = x.shape
    if not layer_params:
        return layernorm(x, ln_a, ln_b, eps=eps)

    M = B * S
    d_ff = layer_params[0][0].shape[0]
    physical = _physical_vmem_bytes()
    budget = int(physical * 0.75)
    tm, M_pad, _, tf, ws = _choose_tiles(
        M, D, d_ff, out_itemsize=max(jnp.dtype(x.dtype).itemsize, 2),
        fuse_ln=True, budget=budget)
    vmem_limit = min(int(physical * 0.85), max(int(ws * 1.5), 32 << 20))

    # One-time flatten / pad / bf16 cast; activations stay bf16 across all layers.
    x2 = x.reshape(M, D)
    if M_pad != M:
        x2 = jnp.pad(x2, ((0, M_pad - M), (0, 0)))
    x2 = x2.astype(jnp.bfloat16)

    ln_a_r = ln_a.reshape(1, D).astype(jnp.float32)
    ln_b_r = ln_b.reshape(1, D).astype(jnp.float32)

    n = len(layer_params)
    for li, (w1, b1, w2, b2) in enumerate(layer_params):
        last = li == n - 1
        # Pre-transpose loop-invariant weights once in the wrapper so both in-kernel
        # matmuls contract ((1,),(0,)) -- no per-step XLU transpose of the RHS.
        w1t = jnp.transpose(w1).astype(jnp.bfloat16)   # (D, d_ff)
        w2t = jnp.transpose(w2).astype(jnp.bfloat16)   # (d_ff, D)
        b1r = b1.reshape(1, -1).astype(jnp.float32)
        b2r = b2.reshape(1, D).astype(jnp.float32)
        x2 = _ffn_layer(
            x2, w1t, b1r, w2t, b2r,
            ln=(ln_a_r, ln_b_r) if last else None,     # fuse final LayerNorm
            out_dtype=x.dtype if last else jnp.bfloat16,
            tm=tm, tf=tf, eps=eps, vmem_limit=vmem_limit)

    return x2[:M].reshape(B, S, D)


# ---------------------------------------------------------------------------
# Self-check.
# ---------------------------------------------------------------------------
if __name__ == "__main__":
    # Small shapes; feature dims kept lane-dense (multiples of 128).
    batch, seq, d_model, d_ff, n_layers = 2, 8, 128, 256, 2

    key = jax.random.PRNGKey(0)
    kx, km, *lkeys = jax.random.split(key, 2 + 4 * n_layers)

    x = jax.random.normal(kx, (batch, seq, d_model), dtype=jnp.float32)
    memory = jax.random.normal(km, (batch, seq, d_model), dtype=jnp.float32)
    src_mask = jnp.ones((batch, 1, seq), dtype=jnp.float32)
    tgt_mask = jnp.ones((batch, seq, seq), dtype=jnp.float32)

    layer_params = []
    for layer in range(n_layers):
        k1, k2, k3, k4 = lkeys[4 * layer: 4 * layer + 4]
        bound1 = 1.0 / (d_model ** 0.5)
        w1 = jax.random.uniform(k1, (d_ff, d_model), minval=-bound1, maxval=bound1,
                                dtype=jnp.float32)
        b1 = jax.random.uniform(k2, (d_ff,), minval=-bound1, maxval=bound1,
                                dtype=jnp.float32)
        bound2 = 1.0 / (d_ff ** 0.5)
        w2 = jax.random.uniform(k3, (d_model, d_ff), minval=-bound2, maxval=bound2,
                                dtype=jnp.float32)
        b2 = jax.random.uniform(k4, (d_model,), minval=-bound2, maxval=bound2,
                                dtype=jnp.float32)
        layer_params.append((w1, b1, w2, b2))

    ln_a = jnp.ones((d_model,), dtype=jnp.float32)
    ln_b = jnp.zeros((d_model,), dtype=jnp.float32)

    out = decoder_forward(x, memory, src_mask, tgt_mask, layer_params, ln_a, ln_b)
    out = jax.block_until_ready(out)

    # Pure-JAX reference mirroring the kernel's bf16/f32 precision policy.
    xb = x.reshape(-1, d_model).astype(jnp.bfloat16)
    ref2 = None
    for li, (w1, b1, w2, b2) in enumerate(layer_params):
        h = jnp.dot(xb, w1.T.astype(jnp.bfloat16),
                    preferred_element_type=jnp.float32) + b1
        h = jnp.maximum(h, 0.0).astype(jnp.bfloat16)
        o = jnp.dot(h, w2.T.astype(jnp.bfloat16),
                    preferred_element_type=jnp.float32) + b2
        if li == n_layers - 1:
            ref2 = o                           # keep f32 for the fused LayerNorm
        else:
            xb = o.astype(jnp.bfloat16)
    mean = ref2.mean(-1, keepdims=True)
    std = jnp.std(ref2, axis=-1, keepdims=True, ddof=1)
    ref = (ln_a * (ref2 - mean) / (std + 1e-6) + ln_b).reshape(batch, seq, d_model)

    assert out.shape == (batch, seq, d_model)
    assert jnp.allclose(out, ref.astype(out.dtype), atol=2e-2, rtol=2e-2), (
        float(jnp.max(jnp.abs(out - ref))))
    print("KERNEL_OK")
</pallas_src>

<mosaic_0001>
module attributes {stable_mosaic.version = 11 : i64} {
  func.func @_ffn_kernel_resident(%arg0: i32, %arg1: memref<8x128xbf16, #tpu.memory_space<vmem>>, %arg2: memref<128x256xbf16, #tpu.memory_space<vmem>>, %arg3: memref<1x256xf32, #tpu.memory_space<vmem>>, %arg4: memref<256x128xbf16, #tpu.memory_space<vmem>>, %arg5: memref<1x128xf32, #tpu.memory_space<vmem>>, %arg6: memref<8x128xbf16, #tpu.memory_space<vmem>>) attributes {dimension_semantics = [#tpu.dimension_semantics<parallel>], iteration_bounds = array<i64: 2>, scalar_prefetch = 0 : i64, scratch_operands = 0 : i64, tpu.core_type = #tpu.core_type<tc>, window_params = [{transform_indices = @transform_0, window_bounds = array<i64: 8, 128>}, {pipeline_mode = #tpu.pipeline_mode<synchronous>, transform_indices = @transform_1, window_bounds = array<i64: 128, 256>}, {pipeline_mode = #tpu.pipeline_mode<synchronous>, transform_indices = @transform_2, window_bounds = array<i64: 1, 256>}, {pipeline_mode = #tpu.pipeline_mode<synchronous>, transform_indices = @transform_3, window_bounds = array<i64: 256, 128>}, {pipeline_mode = #tpu.pipeline_mode<synchronous>, transform_indices = @transform_4, window_bounds = array<i64: 1, 128>}, {transform_indices = @transform_5, window_bounds = array<i64: 8, 128>}]} {
    %c0 = arith.constant 0 : index
    %c0_0 = arith.constant 0 : index
    %0 = vector.load %arg1[%c0, %c0_0] : memref<8x128xbf16, #tpu.memory_space<vmem>>, vector<8x128xbf16>
    %c0_1 = arith.constant 0 : index
    %c0_2 = arith.constant 0 : index
    %1 = vector.load %arg2[%c0_1, %c0_2] : memref<128x256xbf16, #tpu.memory_space<vmem>>, vector<128x256xbf16>
    %cst = arith.constant dense<0.000000e+00> : vector<8x256xf32>
    %2 = tpu.matmul %0, %1, %cst {dimension_numbers = #tpu.dot_dimension_numbers<[1], [0], [0], [1], [0, 0, 1, 1], [], []>} : vector<8x128xbf16>, vector<128x256xbf16>, vector<8x256xf32> -> vector<8x256xf32>
    %c0_3 = arith.constant 0 : index
    %c0_4 = arith.constant 0 : index
    %3 = vector.load %arg3[%c0_3, %c0_4] : memref<1x256xf32, #tpu.memory_space<vmem>>, vector<1x256xf32>
    %4 = vector.broadcast %3 : vector<1x256xf32> to vector<8x256xf32>
    %5 = arith.addf %2, %4 : vector<8x256xf32>
    %cst_5 = arith.constant 0.000000e+00 : f32
    %6 = vector.broadcast %cst_5 : f32 to vector<8x256xf32>
    %7 = arith.maximumf %5, %6 : vector<8x256xf32>
    %8 = arith.truncf %7 : vector<8x256xf32> to vector<8x256xbf16>
    %c0_6 = arith.constant 0 : index
    %c0_7 = arith.constant 0 : index
    %9 = vector.load %arg4[%c0_6, %c0_7] : memref<256x128xbf16, #tpu.memory_space<vmem>>, vector<256x128xbf16>
    %cst_8 = arith.constant dense<0.000000e+00> : vector<8x128xf32>
    %10 = tpu.matmul %8, %9, %cst_8 {dimension_numbers = #tpu.dot_dimension_numbers<[1], [0], [0], [1], [0, 0, 1, 1], [], []>} : vector<8x256xbf16>, vector<256x128xbf16>, vector<8x128xf32> -> vector<8x128xf32>
    %c0_9 = arith.constant 0 : index
    %c0_10 = arith.constant 0 : index
    %11 = vector.load %arg5[%c0_9, %c0_10] : memref<1x128xf32, #tpu.memory_space<vmem>>, vector<1x128xf32>
    %12 = vector.broadcast %11 : vector<1x128xf32> to vector<8x128xf32>
    %13 = arith.addf %10, %12 : vector<8x128xf32>
    %14 = arith.truncf %13 : vector<8x128xf32> to vector<8x128xbf16>
    %c0_11 = arith.constant 0 : index
    %c0_12 = arith.constant 0 : index
    %15 = vector.load %arg6[%c0_11, %c0_12] : memref<8x128xbf16, #tpu.memory_space<vmem>>, vector<8x128xbf16>
    tpu.vector_store %arg6[%c0_11, %c0_12], %14 {strides = array<i32>} : memref<8x128xbf16, #tpu.memory_space<vmem>>, vector<8x128xbf16>,
    return
  }
  func.func @transform_0(%arg0: i32) -> (i32, i32) {
    %c0_i32 = arith.constant 0 : i32
    %c0_i32_0 = arith.constant 0 : i32
    return %arg0, %c0_i32 : i32, i32
  }
  func.func @transform_1(%arg0: i32) -> (i32, i32) {
    %c0_i32 = arith.constant 0 : i32
    %c0_i32_0 = arith.constant 0 : i32
    %c0_i32_1 = arith.constant 0 : i32
    return %c0_i32, %c0_i32_0 : i32, i32
  }
  func.func @transform_2(%arg0: i32) -> (i32, i32) {
    %c0_i32 = arith.constant 0 : i32
    %c0_i32_0 = arith.constant 0 : i32
    %c0_i32_1 = arith.constant 0 : i32
    return %c0_i32, %c0_i32_0 : i32, i32
  }
  func.func @transform_3(%arg0: i32) -> (i32, i32) {
    %c0_i32 = arith.constant 0 : i32
    %c0_i32_0 = arith.constant 0 : i32
    %c0_i32_1 = arith.constant 0 : i32
    return %c0_i32, %c0_i32_0 : i32, i32
  }
  func.func @transform_4(%arg0: i32) -> (i32, i32) {
    %c0_i32 = arith.constant 0 : i32
    %c0_i32_0 = arith.constant 0 : i32
    %c0_i32_1 = arith.constant 0 : i32
    return %c0_i32, %c0_i32_0 : i32, i32
  }
  func.func @transform_5(%arg0: i32) -> (i32, i32) {
    %c0_i32 = arith.constant 0 : i32
    %c0_i32_0 = arith.constant 0 : i32
    return %arg0, %c0_i32 : i32, i32
  }
}

</mosaic_0001>

<bundles_post_ra>
// kernel: tpu_custom_call.1
= control target key start
LH: loop header
LB: loop body
LE: loop exit
PB: predicated region body
PF: predicated region fallthrough
CT: control target
= control target key end

     0   :  { %10 = vsyncpa [#allocation3], 0  ;;  %s1326_s0 = inlined_call_operand.hbm [shape: bf16[16,128], index: 0, kind: input, shape index: {}]   ;;  %s1327_s1 = inlined_call_operand.hbm [shape: bf16[128,256], index: 1, kind: input, shape index: {}]   ;;  %s1328_s2 = inlined_call_operand.vmem [shape: f32[1,256], index: 2, kind: input, shape index: {}]   ;;  %s1329_s3 = inlined_call_operand.hbm [shape: bf16[256,128], index: 3, kind: input, shape index: {}]   ;;  %s1330_s4 = inlined_call_operand.vmem [shape: f32[1,128], index: 4, kind: input, shape index: {}]   ;;  %s1331_s5 = inlined_call_operand.hbm [shape: bf16[16,128], index: 5, kind: output, shape index: {}]  }
   0x1   :  { %12 = vsyncpa [#allocation3 + $0x1], 0 }
   0x2   :  { %13 = vsyncpa [#allocation6], 0 }
   0x3   :  { %14 = vsyncpa [#allocation4], 0 }
   0x4   :  { %16 = vsyncpa [#allocation4 + $0x1], 0  ;;  %s1084_s18 = smov 0   ;;  %s1086_s19 = smov 0  }
   0x5   :  { %s1088_s20 = smov 0   ;;  %s1090_s21 = smov 0  }
   0x6 LB: > { %s1105_s22 = sadd.s32 4294967295, %s1043_s21   ;;  %s704_s23 = sadd.s32 4294967294, %s1043_s21   ;;  %s1043_s21 = sphi %s1090_s21, %s1351_s21   ;;  %s1039_s20 = sphi %s1088_s20, %s1350_s20   ;;  %s1035_s19 = sphi %s1086_s19, %s1349_s19   ;;  %s1031_s18 = sphi %s1084_s18, %s1348_s18  }
   0x7   : > { %p42_p0 = scmp.ne.s32.totalorder %s1035_s19, %s1031_s18  ;;  %p1332_p1 = scmp.eq.s32.totalorder %s1105_s22, 0 }
   0x8   : > { %p156_p3 = scmp.eq.s32.totalorder %s704_s23, 1  ;;  %p705_p5 = scmp.ge.s32.totalorder %s1043_s21, 1 }
   0x9   : > { %p1114_p4 = por %p1332_p1, %p42_p0  ;;  %p163_p7 = scmp.lt.s32.totalorder %s1043_s21, 3 }
   0xa   : > { %p1119_p6 = por %p156_p3, %p42_p0  ;;  %s1045_s27 = smov [#allocation5]  }
   0xb   : > { %s1335_s24 = scalar_select %p1114_p4, 1, 0 }
   0xc   : > { %s1336_s25 = scalar_select %p1119_p6, 1, 0 }
   0xd   : > { %p1124_p8 = pnand %p705_p5, %p163_p7  ;;  %s175_s28 = sshll.u32 %s1045_s27, 4  ;;  %s1128_s28 = int_to_ptr.vmem [resolvable:$true] %s175_s28 }
   0xe   : > { %s1046_s30 = smov [#allocation7]   ;;  %s887_s9 = scalar_lea.hbm %s1327_s1, 2048 }
   0xf   : > { %p787_p9 = pneg %p1124_p8  ;;  %s191_s6 = sshll.u32 %s1046_s30, 4  ;;  %s1139_s6 = int_to_ptr.vmem [resolvable:$true] %s191_s6 }
  0x10   : > { %p888_p12 = scmp.ne.s32.totalorder %s1327_s1, %s887_s9  ;;  %p894_p5 = scmp.lt.u32.totalorder %s887_s9, %s1327_s1 }
  0x11   : > { %p1135_p11 = pnand %p787_p9, %p1332_p1 }
  0x13   : > { %p889_p13 = pneg %p1135_p11 }
  0x15   : > { %p890_p0 = pnand %p889_p13, %p888_p12 }
  0x17   : > { %p891_p3 = pneg %p890_p0 }
  0x19   : > { %p896_p7 = pnand %p894_p5, %p891_p3 }
  0x1b   : > { %899 = shalt.err (!%p896_p7)
}
  0x1c   : > { %s900_s14 = scalar_lea.vmem %s1128_s28, 2048  ;;  %p908_p2 = scmp.lt.s32.totalorder %s1128_s28, %s1128_s28 }
  0x1d   : > { %p901_p9 = scmp.ne.s32.totalorder %s1128_s28, %s900_s14  ;;  %p909_p12 = scmp.lt.s32.totalorder %s900_s14, %s900_s14 }
  0x1f   : > { %p903_p10 = pnand %p901_p9, %p889_p13  ;;  %p910_p0 = por %p909_p12, %p908_p2 }
  0x21   : > { %p904_p1 = pneg %p903_p10 }
  0x23   : > { %p911_p6 = pnand %p910_p0, %p904_p1 }
  0x25   : > { %914 = shalt.err (!%p911_p6)
}
  0x26   : > { %s1047_s15 = smov 128   ;;  %s1048_s16 = smov 8  }
  0x27   : > { %790 = dma.hbm_to_vmem [thread:$0]  (!%p1135_p11), %s1327_s1, 2048, %s1128_s28, [#allocation6], %s1047_s15, %s1047_s15, %s1048_s16  }
  0x28   : > { %s915_s7 = scalar_lea.hbm %s1329_s3, 2048 }
  0x29   : > { %p916_p2 = scmp.ne.s32.totalorder %s1329_s3, %s915_s7  ;;  %p922_p10 = scmp.lt.u32.totalorder %s915_s7, %s1329_s3 }
  0x2b   : > { %p918_p1 = pnand %p916_p2, %p889_p13 }
  0x2d   : > { %p919_p6 = pneg %p918_p1 }
  0x2f   : > { %p924_p3 = pnand %p922_p10, %p919_p6 }
  0x31   : > { %927 = shalt.err (!%p924_p3)
}
  0x32   : > { %s928_s28 = scalar_lea.vmem %s1139_s6, 2048  ;;  %p936_p12 = scmp.lt.s32.totalorder %s1139_s6, %s1139_s6 }
  0x33   : > { %p929_p5 = scmp.ne.s32.totalorder %s1139_s6, %s928_s28  ;;  %p937_p0 = scmp.lt.s32.totalorder %s928_s28, %s928_s28 }
  0x35   : > { %p931_p7 = pnand %p929_p5, %p889_p13  ;;  %p938_p2 = por %p937_p0, %p936_p12 }
  0x37   : > { %p932_p9 = pneg %p931_p7 }
  0x39   : > { %p939_p1 = pnand %p938_p2, %p932_p9 }
  0x3b   : > { %942 = shalt.err (!%p939_p1)
}
  0x3c   : > { %s1049_s12 = smov 64   ;;  %s1050_s13 = smov 4  }
  0x3d   : > { %793 = dma.hbm_to_vmem [thread:$0]  (!%p1135_p11), %s1329_s3, 2048, %s1139_s6, [#allocation6], %s1049_s12, %s1049_s12, %s1050_s13  }
  0x3e   : > { %s1194_s16 = sadd.s32 1, %s1043_s21   ;;  %s29_s23 = sadd.s32 1, %s1039_s20 }
  0x3f   : > { %s26_s17 = ssub.s32 %s1043_s21, %s1194_s16  ;;  %p36_p6 = scmp.ne.s32.totalorder %s1039_s20, %s1035_s19 }
  0x40   : > { %p27_p13 = scmp.eq.s32.totalorder %s26_s17, 0  ;;  %p37_p10 = scmp.eq.s32.totalorder %s1043_s21, 0 }
  0x41   : > { %p1339_p5 = scmp.eq.s32.totalorder %s1105_s22, 1  ;;  %p804_p9 = scmp.lt.s32.totalorder %s1043_s21, 2 }
  0x42   : > { %s1203_s27 = scalar_select %p27_p13, %s1039_s20, %s29_s23  }
  0x43   : > { %p38_p3 = por %p37_p10, %p36_p6  ;;  %p1207_p7 = por %p1339_p5, %p36_p6 }
  0x44   : > { %s208_s29 = sand.u32 1, %s1039_s20   ;;  %s710_s6 = sshll.u32 %s1043_s21, 6 }
  0x45   : > { %s1340_s30 = scalar_select %p1207_p7, 1, 0 }
  0x46   : > { %s709_s7 = sshll.u32 %s208_s29, 2  ;;  %s1217_s10 = scalar_lea.hbm %s1326_s0, %s710_s6 }
  0x47   : > { %s212_s11 = scalar_lea.vmem [#allocation2], %s709_s7  ;;  %p1221_p11 = pnand %p804_p9, %p38_p3 }
  0x48   : > { %s219_s28 = sshll.u32 %s212_s11, 4  ;;  %s209_s13 = scalar_lea.sflag [#allocation3], %s208_s29  ;;  %s1219_s28 = int_to_ptr.vmem [resolvable:$true] %s219_s28 }
  0x49   : > { %s943_s14 = scalar_lea.hbm %s1217_s10, 64  ;;  %p945_p0 = pneg %p1221_p11 }
  0x4a   : > { %p944_p12 = scmp.ne.s32.totalorder %s1217_s10, %s943_s14  ;;  %s948_s23 = scalar_lea.hbm %s1326_s0, 128 }
  0x4b   : > { %p949_p13 = scmp.lt.u32.totalorder %s1217_s10, %s1326_s0  ;;  %p950_p6 = scmp.lt.u32.totalorder %s948_s23, %s943_s14 }
  0x4c   : > { %p946_p2 = pnand %p945_p0, %p944_p12  ;;  %p952_p3 = scmp.lt.u32.totalorder %s943_s14, %s1217_s10 }
  0x4d   : > { %p951_p10 = por %p950_p6, %p949_p13 }
  0x4e   : > { %p947_p1 = pneg %p946_p2 }
  0x4f   : > { %p953_p5 = por %p952_p3, %p951_p10 }
  0x51   : > { %p954_p9 = pnand %p953_p5, %p947_p1 }
  0x53   : > { %957 = shalt.err (!%p954_p9)
}
  0x54   : > { %s958_s29 = scalar_lea.vmem %s1219_s28, 64  ;;  %s1051_s8 = smov [#allocation2]  }
  0x55   : > { %p959_p12 = scmp.ne.s32.totalorder %s1219_s28, %s958_s29  ;;  %s963_s9 = sshll.u32 %s1051_s8, 4  ;;  %s964_s9 = int_to_ptr.vmem [resolvable:$false] %s963_s9 }
  0x56   : > { %s965_s11 = scalar_lea.vmem %s964_s9, 128  ;;  %p966_p4 = scmp.lt.s32.totalorder %s1219_s28, %s964_s9 }
  0x57   : > { %p961_p2 = pnand %p959_p12, %p945_p0  ;;  %p967_p13 = scmp.lt.s32.totalorder %s965_s11, %s958_s29 }
  0x59   : > { %p962_p7 = pneg %p961_p2  ;;  %p968_p6 = por %p967_p13, %p966_p4 }
  0x5b   : > { %p969_p10 = pnand %p968_p6, %p962_p7 }
  0x5d   : > { %972 = shalt.err (!%p969_p10)
}
  0x5e   : > { %797 = dma.hbm_to_vmem [thread:$0]  (!%p1221_p11), %s1217_s10, 64, %s1219_s28, %s209_s13  }
  0x5f   : > { %228 = sbr.rel (%p1124_p8) target bundleno = 592 (0x250), region = 40  ;;  %s1253_s14 = sand.u32 (!%p1124_p8), 1, %s1035_s19  }
  0x60   : > { %s712_s15 = sshll.u32 (!%p1124_p8), %s1253_s14, 2  ;;  %s231_s17 = scalar_lea.sflag (!%p1124_p8), [#allocation3], %s1253_s14 }
  0x61   : > { %s1259_s23 = scalar_lea.vmem (!%p1124_p8), [#allocation2], %s712_s15  ;;  %p1342_p4 = scmp.ne.s32.totalorder (!%p1124_p8), %s1335_s24, 0 }
  0x66   : > { %1018 = dma.done.wait (%p1342_p4), %s231_s17, 64  }
  0x67   : > { %1020 = vsyncadd (%p1342_p4), %s231_s17, 4294967232  ;;  %p1343_p7 = scmp.eq.s32.totalorder %s1105_s22, 0 }
  0x69   : > { %1022 = dma.done.wait (%p1343_p7), [#allocation6], 4096   ;;  %p1344_p8 = pmov %p1343_p7 }
  0x6a   : > { %v1052_v0 = vmov 0   ;;  %v847_v1 = vld [vmem:[#allocation5 + $0x4] ss:$8 sps:$4 sm:$0xff]   ;;  %v849_v2 = vld [vmem:[#allocation5] ss:$8 sps:$4 sm:$0xff]   ;;  %v875_v15 = vld [vmem:[#allocation7 + $0x50] sm:$0xff]   ;;  %v289_v34 = vlaneseq }
  0x6b   : > { %1024 = vsyncadd (%p1344_p8), [#allocation6], 4294963200  ;;  %411 = vmatprep.mubr.bf16.mxu0 %v1052_v0  ;;  %379 = vmatprep.subr.bf16.mxu0 %v847_v1  ;;  %v850_v3 = vld [vmem:[#allocation5 + $0x14] ss:$8 sps:$4 sm:$0xff]   ;;  %v852_v4 = vld [vmem:[#allocation5 + $0x10] ss:$8 sps:$4 sm:$0xff]  }
  0x6c   : > { %380 = vmatpush1.bf16.msra.mxu0 %v849_v2  ;;  %v853_v5 = vld [vmem:[#allocation5 + $0x24] ss:$8 sps:$4 sm:$0xff]   ;;  %v855_v6 = vld [vmem:[#allocation5 + $0x20] ss:$8 sps:$4 sm:$0xff]   ;;  %v856_v7 = vld [vmem:[#allocation5 + $0x34] ss:$8 sps:$4 sm:$0xff]  }
  0x6d   : > { %381 = vmatprep.subr.bf16.mxu0 %v850_v3  ;;  %v858_v8 = vld [vmem:[#allocation5 + $0x30] ss:$8 sps:$4 sm:$0xff]   ;;  %v859_v9 = vld [vmem:[#allocation5 + $0x44] ss:$8 sps:$4 sm:$0xff]   ;;  %v861_v12 = vld [vmem:[#allocation5 + $0x40] ss:$8 sps:$4 sm:$0xff]  }
  0x6e   : > { %v871_v10 = vld [vmem:[#allocation7 + $0x40] sm:$0xff]   ;;  %v873_v13 = vld [vmem:[#allocation7 + $0x48] sm:$0xff]   ;;  %v862_v16 = vld [vmem:[#allocation5 + $0x54] ss:$8 sps:$4 sm:$0xff]   ;;  %v290_v35 = vshrl.u32 %v289_v34, 7  ;;  %s750_s12 = sshll.u32 %s1105_s22, 6 }
  0x6f   : > { %v872_v11 = vld [vmem:[#allocation7] sm:$0xff]   ;;  %753 = vmatprep.subr.bf16.mxu1 %v871_v10  ;;  %v874_v14 = vld [vmem:[#allocation7 + $0x8] sm:$0xff]   ;;  %v864_v17 = vld [vmem:[#allocation5 + $0x50] ss:$8 sps:$4 sm:$0xff]   ;;  %s268_s13 = scalar_lea.vmem [#allocation8], %s712_s15  ;;  %s1282_s8 = scalar_lea.hbm %s1331_s5, %s750_s12 }
  0x70   : > { %382 = vmatpush1.bf16.msra.mxu0 %v852_v4  ;;  %754 = vmatpush3.bf16.msra.mxu1 %v872_v11  ;;  %v876_v18 = vld [vmem:[#allocation7 + $0x10] sm:$0xff]   ;;  %v877_v19 = vld [vmem:[#allocation7 + $0x58] sm:$0xff]   ;;  %v865_v20 = vld [vmem:[#allocation5 + $0x64] ss:$8 sps:$4 sm:$0xff]   ;;  %v291_v36 = vsub.s32 0, %v290_v35  ;;  %v295_v38 = vsub.s32 1, %v290_v35 }
  0x71   : > { %383 = vmatprep.subr.bf16.mxu0 %v853_v5  ;;  %755 = vmatprep.subr.bf16.mxu1 %v873_v13  ;;  %v867_v21 = vld [vmem:[#allocation5 + $0x60] ss:$8 sps:$4 sm:$0xff]   ;;  %v868_v22 = vld [vmem:[#allocation5 + $0x74] ss:$8 sps:$4 sm:$0xff]   ;;  %v870_v26 = vld [vmem:[#allocation5 + $0x70] ss:$8 sps:$4 sm:$0xff]  }
  0x72   : > { %v878_v23 = vld [vmem:[#allocation7 + $0x18] sm:$0xff]   ;;  %v879_v24 = vld [vmem:[#allocation7 + $0x60] sm:$0xff]   ;;  %v881_v27 = vld [vmem:[#allocation7 + $0x68] sm:$0xff]   ;;  %s615_s7 = sshll.u32 %s268_s13, 4  ;;  %s602_s9 = scalar_lea.sflag [#allocation4], %s1253_s14  ;;  %s1284_s7 = int_to_ptr.vmem [resolvable:$true] %s615_s7 }
  0x73   : > { %v880_v25 = vld [vmem:[#allocation7 + $0x20] sm:$0xff]   ;;  %v882_v28 = vld [vmem:[#allocation7 + $0x28] sm:$0xff]   ;;  %v270_v29 = vld [vmem:[%s1259_s23] sm:$0xf]  ;;  %s973_s11 = scalar_lea.vmem %s1284_s7, 64  ;;  %p1345_p0 = scmp.ne.s32.totalorder %s1340_s30, 0 }
  0x74   : > { %384 = vmatpush1.bf16.msra.mxu0 %v855_v6  ;;  %756 = vmatpush3.bf16.msra.mxu1 %v874_v14  ;;  %v883_v30 = vld [vmem:[#allocation7 + $0x70] sm:$0xff]   ;;  %v885_v32 = vld [vmem:[#allocation7 + $0x78] sm:$0xff]   ;;  %p974_p11 = scmp.ne.s32.totalorder %s1284_s7, %s973_s11  ;;  %s1053_s22 = smov [#allocation8]  }
  0x75   : > { %385 = vmatprep.subr.bf16.mxu0 %v856_v7  ;;  %757 = vmatprep.subr.bf16.mxu1 %v875_v15  ;;  %v884_v31 = vld [vmem:[#allocation7 + $0x30] sm:$0xff]   ;;  %v886_v33 = vld [vmem:[#allocation7 + $0x38] sm:$0xff]   ;;  %s977_s15 = sshll.u32 %s1053_s22, 4  ;;  %s978_s15 = int_to_ptr.vmem [resolvable:$false] %s977_s15 }
  0x76   : > { %v287_v37 = vld [vmem:[%s1328_s2] sm:$0x3]  ;;  %p975_p1 = pnand %p974_p11, %p1345_p0  ;;  %s979_s17 = scalar_lea.vmem %s978_s15, 128 }
  0x77   : > { %v292_v39 = vrot.slane %v287_v37, %v291_v36  ;;  %v296_v40 = vrot.slane %v287_v37, %v295_v38  ;;  %v732_v52 = vld [vmem:[%s1330_s4] ss:$0 sm:$0xff]  ;;  %p980_p5 = scmp.lt.s32.totalorder %s1284_s7, %s978_s15  ;;  %p981_p9 = scmp.lt.s32.totalorder %s979_s17, %s973_s11 }
  0x78   : > { %386 = vmatpush1.bf16.msra.mxu0 %v858_v8  ;;  %758 = vmatpush3.bf16.msra.mxu1 %v876_v18  ;;  %p976_p3 = pneg %p975_p1 }
  0x79   : > { %387 = vmatprep.subr.bf16.mxu0 %v859_v9  ;;  %759 = vmatprep.subr.bf16.mxu1 %v877_v19  ;;  %p982_p12 = por %p981_p9, %p980_p5 }
  0x7b   : > { %p983_p2 = pnand %p982_p12, %p976_p3 }
  0x7c   : > { %388 = vmatpush1.bf16.msra.mxu0 %v861_v12  ;;  %760 = vmatpush3.bf16.msra.mxu1 %v878_v23 }
  0x7d   : > { %389 = vmatprep.subr.bf16.mxu0 %v862_v16  ;;  %761 = vmatprep.subr.bf16.mxu1 %v879_v24 }
  0x80   : > { %390 = vmatpush1.bf16.msra.mxu0 %v864_v17  ;;  %762 = vmatpush3.bf16.msra.mxu1 %v880_v25 }
  0x81   : > { %391 = vmatprep.subr.bf16.mxu0 %v865_v20  ;;  %763 = vmatprep.subr.bf16.mxu1 %v881_v27 }
  0x84   : > { %392 = vmatpush1.bf16.msra.mxu0 %v867_v21  ;;  %764 = vmatpush3.bf16.msra.mxu1 %v882_v28 }
  0x85   : > { %393 = vmatprep.subr.bf16.mxu0 %v868_v22  ;;  %765 = vmatprep.subr.bf16.mxu1 %v883_v30 }
  0x88   : > { %394 = vmatpush1.bf16.msra.mxu0 %v870_v26  ;;  %766 = vmatpush3.bf16.msra.mxu1 %v884_v31 }
  0x89   : > { %767 = vmatprep.subr.bf16.mxu1 %v885_v32 }
  0x8b   : > { %412 = vmatmul.mubr.bf16.vlgmr.msra.gmra.mrb[0].mxu0 %v270_v29 }
  0x8c   : > { %768 = vmatpush3.bf16.msra.mxu1 %v886_v33 }
 0x15e   : > { %v413_v41 = vpop.f32.mrb[0].mxu0 }
 0x15f   : > { %v414_v42 = vadd.f32 %v413_v41, %v292_v39  ;;  %v415_v43 = vpop.f32.mrb[1].mxu0 }
 0x160   : > { %v416_v44 = vadd.f32 %v415_v43, %v296_v40  ;;  %v417_v45 = vpop.f32.mrb[2].mxu0 }
 0x161   : > { %v420_v46 = vmax.f32 %v414_v42, 0.0  ;;  %v418_v47 = vpop.f32.mrb[3].mxu0 }
 0x162   : > { %v421_v48 = vmax.f32 %v416_v44, 0.0 }
 0x163   : > { %v422_v50 = vpack.c.bf16 %v420_v46, %v420_v46 }
 0x164   : > { %v423_v49 = vpack.c.bf16 %v421_v48, %v421_v48 }
 0x166   : > { %591 = vmatprep.mubr.bf16.mxu1 %v423_v49 }
 0x167   : > { %592 = vmatmul.mubr.bf16.vlgmr.msra.gmra.mrb[0].mxu1 %v422_v50 }
 0x23a   : > { %v769_v51 = vpop.f32.mrb[0].mxu1 }
 0x23b   : > { %v770_v53 = vpop.f32.mrb[1].mxu1 }
 0x23c   : > { %v771_v54 = vadd.f32 %v770_v53, %v769_v51  ;;  %v772_v55 = vpop.f32.mrb[2].mxu1 }
 0x23d   : > { %v773_v56 = vpop.f32.mrb[3].mxu1 }
 0x23e   : > { %v594_v57 = vadd.f32 %v771_v54, %v732_v52 }
 0x240   : > { %v599_v58 = vpack.c.bf16 %v594_v57, %v594_v57 }
 0x242   : > { %600 = vst [vmem:[%s268_s13] sm:$0xf] %v599_v58 }
 0x243   : > { %986 = shalt.err (!%p983_p2)
}
 0x244   : > { %s987_s14 = scalar_lea.hbm %s1282_s8, 64  ;;  %s991_s26 = scalar_lea.hbm %s1331_s5, 128 }
 0x245   : > { %p988_p13 = scmp.ne.s32.totalorder %s1282_s8, %s987_s14  ;;  %p992_p4 = scmp.lt.u32.totalorder %s1282_s8, %s1331_s5 }
 0x246   : > { %p993_p7 = scmp.lt.u32.totalorder %s991_s26, %s987_s14  ;;  %p995_p11 = scmp.lt.u32.totalorder %s987_s14, %s1282_s8 }
 0x247   : > { %p989_p6 = pnand %p988_p13, %p1345_p0 }
 0x248   : > { %p994_p8 = por %p993_p7, %p992_p4 }
 0x249   : > { %p990_p10 = pneg %p989_p6 }
 0x24a   : > { %p996_p1 = por %p995_p11, %p994_p8 }
 0x24c   : > { %p997_p3 = pnand %p996_p1, %p990_p10 }
 0x24e   : > { %1000 = shalt.err (!%p997_p3)
}
 0x24f   : > { %785 = dma.vmem_to_hbm [thread:$0]  (%p1345_p0), %s1284_s7, 64, %s1282_s8, %s602_s9  }
 0x250 PF: > { %s627_s12 = sand.u32 1, %s1031_s18   ;;  %p1346_p5 = scmp.ne.s32.totalorder %s1336_s25, 0 }
 0x251   : > { %p1347_p9 = scmp.ge.s32.totalorder %s1043_s21, 2  ;;  %s628_s13 = scalar_lea.sflag [#allocation4], %s627_s12 }
 0x253   : > { %p799_p12 = pnand %p1347_p9, %p1346_p5 }
 0x255   : > { %1026 = dma.done.wait (!%p799_p12), %s628_s13, 64  }
 0x256   : > { %1028 = vsyncadd (!%p799_p12), %s628_s13, 4294967232  ;;  %p19_p2 = scmp.ge.s32.totalorder %s1194_s16, 4   ;;  %s1348_s18 = smov %s1035_s19 }
 0x257   : > { %s1349_s19 = smov %s1039_s20  ;;  %s1350_s20 = smov %s1203_s27 }
 0x258   : > { %s1351_s21 = smov %s1194_s16  ;;  %21 = sbr.rel (!%p19_p2) target bundleno = 6 (0x6), region = 93 }
 0x25f   :  { %633 = vsyncpa [#allocation3], 1 }
 0x260   :  { %635 = vsyncpa [#allocation3 + $0x1], 1 }
 0x261   :  { %636 = vsyncpa [#allocation6], 1 }
 0x262   :  { %637 = vsyncpa [#allocation4], 1 }
 0x263   :  { %639 = vsyncpa [#allocation4 + $0x1], 1 }

</bundles_post_ra>
